<compile_context>
chip_gen: v5e
topology: v5e:2x2
jax: 0.10.0
libtpu: 0.0.40
codegen_flags: <defaults>
</compile_context>

<pallas_src>
import jax
import jax.numpy as jnp
from jax.experimental import pallas as pl
from jax.experimental.pallas import tpu as pltpu

KH = KW = 3      # kernel_size=3
PAD = 1          # padding=1 (SAME)
BN_EPS = 0.001   # BatchNorm2d(eps=0.001)


def _border_mask(H, W):
    """(KH*KW, H*W) {0,1} mask: output positions whose shifted tap is in-image."""
    rows = jnp.arange(H)
    cols = jnp.arange(W)
    taps = []
    for kh in range(KH):
        for kw in range(KW):
            dh, dw = kh - PAD, kw - PAD
            mr = (rows + dh >= 0) & (rows + dh < H)            # (H,)
            mc = (cols + dw >= 0) & (cols + dw < W)            # (W,)
            taps.append(jnp.outer(mr, mc).reshape(H * W))
    return jnp.stack(taps).astype(jnp.bfloat16)                # (9, H*W)


def _make_kernel(N, H, W, Cin, Cout, block_n, bn_eps):
    HW = H * W
    inv_count = 1.0 / float(N * HW)

    def kernel(x_ref, w_ref, mask_ref, gamma_ref, beta_ref, o_ref,
               conv_ref, sum_ref, cssq_ref):
        # x_ref    : (block_n, Cin, HW)    activations for this batch block
        # w_ref    : (KH*KW, Cout, Cin)    bf16 per-tap weight matrices (const)
        # mask_ref : (KH*KW, HW)           bf16 border masks (const)
        # gamma/beta: (Cout, 1) f32        BN affine params (const)
        # o_ref    : (block_n, Cout, HW)   per-step output block (written pass 2)
        # conv_ref : (N, Cout, HW) bf16    VMEM-resident raw conv result
        # sum_ref / cssq_ref: (Cout, 1) f32 BN statistic accumulators
        p = pl.program_id(0)   # 0: conv + sum, 1: centered sumsq, 2: BN + ReLU
        b = pl.program_id(1)   # batch-block index

        @pl.when(jnp.logical_and(p == 0, b == 0))
        def _init_stats():
            sum_ref[...] = jnp.zeros_like(sum_ref)
            cssq_ref[...] = jnp.zeros_like(cssq_ref)

        @pl.when(p == 0)
        def _conv_and_sum():
            masks = mask_ref[...]                              # (9, HW) bf16
            for j in range(block_n):                           # static unroll
                xj = x_ref[j].astype(jnp.float32)              # (Cin, HW)
                y = None
                for t in range(KH * KW):
                    kh, kw = divmod(t, KW)
                    s = (kh - PAD) * W + (kw - PAD)
                    # Shifted tap in the lane-flattened layout. jnp.roll wraps,
                    # but every wrapped position is zeroed by the border mask.
                    tap = xj if s == 0 else jnp.roll(xj, -s, axis=1)
                    tap = tap.astype(jnp.bfloat16)             # bf16 MXU input
                    if s != 0:
                        tap = tap * masks[t:t + 1, :]          # (Cin,HW)*(1,HW)
                    # Accumulating K=Cin dot: no im2col patch buffer / stores.
                    contrib = jnp.dot(w_ref[t], tap,
                                      preferred_element_type=jnp.float32)
                    y = contrib if y is None else y + contrib  # (Cout, HW) f32
                conv_ref[b * block_n + j] = y.astype(jnp.bfloat16)
                sum_ref[...] += jnp.sum(y, axis=1, keepdims=True)

        @pl.when(p == 1)
        def _centered_sumsq():                                 # two-pass variance
            mean = sum_ref[...] * inv_count                    # (Cout, 1)
            for j in range(block_n):
                y = conv_ref[b * block_n + j].astype(jnp.float32)
                d = y - mean
                cssq_ref[...] += jnp.sum(d * d, axis=1, keepdims=True)

        @pl.when(p == 2)
        def _bn_relu():
            mean = sum_ref[...] * inv_count
            var = cssq_ref[...] * inv_count                    # population var
            scale = gamma_ref[...] * jax.lax.rsqrt(var + bn_eps)
            bias = beta_ref[...] - mean * scale
            for j in range(block_n):
                y = conv_ref[b * block_n + j].astype(jnp.float32)
                o_ref[j] = jnp.maximum(y * scale + bias, 0.0).astype(o_ref.dtype)

    return kernel


def basic_conv2d(x_nchw, weight_oihw, gamma, beta, *, block_n=1):
    """Fused Conv2d(3x3, pad=1, no bias) + BatchNorm2d (batch stats) + ReLU.

    x: (N, Cin, H, W) NCHW; weight: (Cout, Cin, 3, 3); gamma/beta: (Cout,).
    block_n = batch elements per grid step (raise it for bigger shapes so the
    dot RHS has several thousand lanes; keep N % block_n == 0).
    """
    N, Cin, H, W = x_nchw.shape
    Cout = weight_oihw.shape[0]
    HW = H * W
    assert weight_oihw.shape == (Cout, Cin, KH, KW)
    assert N % block_n == 0
    NB = N // block_n

    # Layout-only glue: flatten spatial dims into the lane axis (metadata-only
    # reshape of contiguous NCHW), keep the caller's activation dtype (no
    # wrapper upcast), and repack weights once as 9 bf16 (Cout, Cin) taps.
    x_flat = x_nchw.reshape(N, Cin, HW)
    w_taps = jnp.transpose(weight_oihw, (2, 3, 0, 1)).reshape(KH * KW, Cout, Cin)
    w_taps = w_taps.astype(jnp.bfloat16)
    mask = _border_mask(H, W)                                  # (9, HW) bf16
    gamma2 = gamma.reshape(Cout, 1).astype(jnp.float32)
    beta2 = beta.reshape(Cout, 1).astype(jnp.float32)

    kernel = _make_kernel(N, H, W, Cin, Cout, block_n, BN_EPS)

    # Explicit VMEM budget: bf16 resident conv intermediate + double-buffered
    # input/output blocks + constants, with headroom, capped for v7x (64 MiB).
    est = (N * Cout * HW * 2
           + 2 * block_n * Cin * HW * x_flat.dtype.itemsize
           + 2 * block_n * Cout * HW * 4
           + KH * KW * Cout * 128 * 2
           + KH * KW * HW * 2
           + 8 * Cout * 128 * 4)
    vmem_limit = int(min(64 * 1024 * 1024, max(16 * 1024 * 1024, 4 * est)))

    out_flat = pl.pallas_call(
        kernel,
        out_shape=jax.ShapeDtypeStruct((N, Cout, HW), jnp.float32),
        grid_spec=pltpu.PrefetchScalarGridSpec(
            num_scalar_prefetch=0,
            # pass 0: conv + sum (reads x); pass 1: centered sumsq (VMEM only);
            # pass 2: BN + ReLU with pipelined per-block output writeback.
            grid=(3, NB),
            in_specs=[
                # x is only needed during pass 0; afterwards the map stays on
                # the last block so no refetch DMA is issued.
                pl.BlockSpec((block_n, Cin, HW),
                             lambda p, b: (jnp.where(p == 0, b, NB - 1), 0, 0)),
                pl.BlockSpec((KH * KW, Cout, Cin), lambda p, b: (0, 0, 0)),
                pl.BlockSpec((KH * KW, HW), lambda p, b: (0, 0)),
                pl.BlockSpec((Cout, 1), lambda p, b: (0, 0)),
                pl.BlockSpec((Cout, 1), lambda p, b: (0, 0)),
            ],
            # Output block index only advances during pass 2, so each block is
            # flushed right after it is written and the DMA overlaps the next
            # block's BN-apply (no serialized tail writeback).
            out_specs=pl.BlockSpec((block_n, Cout, HW),
                                   lambda p, b: (jnp.where(p == 2, b, 0), 0, 0)),
            scratch_shapes=[
                pltpu.VMEM((N, Cout, HW), jnp.bfloat16),   # resident conv result
                pltpu.VMEM((Cout, 1), jnp.float32),        # per-channel sum
                pltpu.VMEM((Cout, 1), jnp.float32),        # centered sum-of-squares
            ],
        ),
        compiler_params=pltpu.CompilerParams(
            # BN statistics carry across both grid axes -> both "arbitrary".
            dimension_semantics=("arbitrary", "arbitrary"),
            vmem_limit_bytes=vmem_limit,
        ),
    )(x_flat, w_taps, mask, gamma2, beta2)

    return out_flat.reshape(N, Cout, H, W)   # metadata-only reshape back to NCHW


def _reference(x_nchw, weight_oihw, gamma, beta):
    """Pure-JAX reference matching the PyTorch training-mode forward."""
    y = jax.lax.conv_general_dilated(
        x_nchw, weight_oihw, window_strides=(1, 1), padding="SAME",
        dimension_numbers=("NCHW", "OIHW", "NCHW"))
    mean = y.mean(axis=(0, 2, 3), keepdims=True)
    var = ((y - mean) ** 2).mean(axis=(0, 2, 3), keepdims=True)
    xhat = (y - mean) * jax.lax.rsqrt(var + BN_EPS)
    out = xhat * gamma.reshape(1, -1, 1, 1) + beta.reshape(1, -1, 1, 1)
    return jnp.maximum(out, 0.0)


if __name__ == "__main__":
    N, Cin, Cout, H, W = 2, 4, 8, 16, 16

    key = jax.random.PRNGKey(0)
    kx, kw = jax.random.split(key)
    x = jax.random.normal(kx, (N, Cin, H, W), dtype=jnp.float32)
    weight = jax.random.normal(kw, (Cout, Cin, KH, KW), dtype=jnp.float32) * 0.1
    # BatchNorm affine params (deterministic, synthetic)
    gamma = jnp.linspace(0.5, 1.5, Cout, dtype=jnp.float32)
    beta = jnp.linspace(-0.2, 0.2, Cout, dtype=jnp.float32)

    out = basic_conv2d(x, weight, gamma, beta, block_n=1)
    out = jax.block_until_ready(out)
    assert out.shape == (N, Cout, H, W)

    # Implementation check vs. a reference using the same bf16-rounded conv
    # inputs (the kernel intentionally runs the MXU in bf16 with f32 accum).
    x16 = x.astype(jnp.bfloat16).astype(jnp.float32)
    w16 = weight.astype(jnp.bfloat16).astype(jnp.float32)
    ref_bf16 = _reference(x16, w16, gamma, beta)
    assert jnp.allclose(out, ref_bf16, atol=3e-2, rtol=3e-2), \
        "mismatch vs bf16-matched reference"

    # Module-semantics check vs. the exact f32 reference at bf16-level tolerance.
    ref_f32 = _reference(x, weight, gamma, beta)
    assert jnp.allclose(out, ref_f32, atol=1e-1, rtol=1e-1), \
        "mismatch vs f32 reference"

    print("KERNEL_OK")
</pallas_src>

<mosaic_0001>
module attributes {stable_mosaic.version = 11 : i64} {
  func.func @kernel(%arg0: i32, %arg1: i32, %arg2: memref<1x4x256xf32, #tpu.memory_space<vmem>>, %arg3: memref<9x8x4xbf16, #tpu.memory_space<vmem>>, %arg4: memref<9x256xbf16, #tpu.memory_space<vmem>>, %arg5: memref<8x1xf32, #tpu.memory_space<vmem>>, %arg6: memref<8x1xf32, #tpu.memory_space<vmem>>, %arg7: memref<1x8x256xf32, #tpu.memory_space<vmem>>, %arg8: memref<2x8x256xbf16, #tpu.memory_space<vmem>>, %arg9: memref<8x1xf32, #tpu.memory_space<vmem>>, %arg10: memref<8x1xf32, #tpu.memory_space<vmem>>) attributes {dimension_semantics = [#tpu.dimension_semantics<arbitrary>, #tpu.dimension_semantics<arbitrary>], iteration_bounds = array<i64: 3, 2>, scalar_prefetch = 0 : i64, scratch_operands = 3 : i64, tpu.core_type = #tpu.core_type<tc>, window_params = [{transform_indices = @transform_0, window_bounds = array<i64: 1, 4, 256>}, {pipeline_mode = #tpu.pipeline_mode<synchronous>, transform_indices = @transform_1, window_bounds = array<i64: 9, 8, 4>}, {pipeline_mode = #tpu.pipeline_mode<synchronous>, transform_indices = @transform_2, window_bounds = array<i64: 9, 256>}, {pipeline_mode = #tpu.pipeline_mode<synchronous>, transform_indices = @transform_3, window_bounds = array<i64: 8, 1>}, {pipeline_mode = #tpu.pipeline_mode<synchronous>, transform_indices = @transform_4, window_bounds = array<i64: 8, 1>}, {transform_indices = @transform_5, window_bounds = array<i64: 1, 8, 256>}]} {
    %c0_i32 = arith.constant 0 : i32
    %0 = arith.cmpi eq, %arg0, %c0_i32 : i32
    %c0_i32_0 = arith.constant 0 : i32
    %1 = arith.cmpi eq, %arg1, %c0_i32_0 : i32
    %2 = arith.andi %0, %1 : i1
    %3 = arith.extui %2 : i1 to i32
    %c0_i32_1 = arith.constant 0 : i32
    %4 = arith.cmpi ne, %3, %c0_i32_1 : i32
    scf.if %4 {
      %cst = arith.constant 0.000000e+00 : f32
      %14 = vector.broadcast %cst : f32 to vector<8x1xf32>
      %c0 = arith.constant 0 : index
      %c0_6 = arith.constant 0 : index
      %15 = vector.load %arg9[%c0, %c0_6] : memref<8x1xf32, #tpu.memory_space<vmem>>, vector<8x1xf32>
      tpu.vector_store %arg9[%c0, %c0_6], %14 {strides = array<i32>} : memref<8x1xf32, #tpu.memory_space<vmem>>, vector<8x1xf32>,
      %cst_7 = arith.constant 0.000000e+00 : f32
      %16 = vector.broadcast %cst_7 : f32 to vector<8x1xf32>
      %c0_8 = arith.constant 0 : index
      %c0_9 = arith.constant 0 : index
      %17 = vector.load %arg10[%c0_8, %c0_9] : memref<8x1xf32, #tpu.memory_space<vmem>>, vector<8x1xf32>
      tpu.vector_store %arg10[%c0_8, %c0_9], %16 {strides = array<i32>} : memref<8x1xf32, #tpu.memory_space<vmem>>, vector<8x1xf32>,
    } else {
    }
    %c0_i32_2 = arith.constant 0 : i32
    %5 = arith.cmpi eq, %arg0, %c0_i32_2 : i32
    %6 = arith.extui %5 : i1 to i32
    %c0_i32_3 = arith.constant 0 : i32
    %7 = arith.cmpi ne, %6, %c0_i32_3 : i32
    scf.if %7 {
      %c0 = arith.constant 0 : index
      %c0_6 = arith.constant 0 : index
      %14 = vector.load %arg4[%c0, %c0_6] : memref<9x256xbf16, #tpu.memory_space<vmem>>, vector<9x256xbf16>
      %c0_7 = arith.constant 0 : index
      %c0_8 = arith.constant 0 : index
      %c0_9 = arith.constant 0 : index
      %15 = vector.load %arg2[%c0_7, %c0_8, %c0_9] : memref<1x4x256xf32, #tpu.memory_space<vmem>>, vector<1x4x256xf32>
      %16 = vector.shape_cast %15 : vector<1x4x256xf32> to vector<4x256xf32>
      %17 = vector.extract_strided_slice %16 {offsets = [0, 239], sizes = [4, 17], strides = [1, 1]} : vector<4x256xf32> to vector<4x17xf32>
      %18 = vector.extract_strided_slice %16 {offsets = [0, 0], sizes = [4, 239], strides = [1, 1]} : vector<4x256xf32> to vector<4x239xf32>
      %19 = tpu.concatenate %17, %18 in 1 : vector<4x17xf32>, vector<4x239xf32> -> vector<4x256xf32>
      %20 = arith.truncf %19 : vector<4x256xf32> to vector<4x256xbf16>
      %21 = vector.extract_strided_slice %14 {offsets = [0, 0], sizes = [1, 256], strides = [1, 1]} : vector<9x256xbf16> to vector<1x256xbf16>
      %22 = vector.broadcast %21 : vector<1x256xbf16> to vector<4x256xbf16>
      %23 = arith.mulf %20, %22 : vector<4x256xbf16>
      %c0_10 = arith.constant 0 : index
      %c0_11 = arith.constant 0 : index
      %c0_12 = arith.constant 0 : index
      %24 = vector.load %arg3[%c0_10, %c0_11, %c0_12] : memref<9x8x4xbf16, #tpu.memory_space<vmem>>, vector<1x8x4xbf16>
      %25 = vector.shape_cast %24 : vector<1x8x4xbf16> to vector<8x4xbf16>
      %cst = arith.constant dense<0.000000e+00> : vector<8x256xf32>
      %26 = tpu.matmul %25, %23, %cst {dimension_numbers = #tpu.dot_dimension_numbers<[1], [0], [0], [1], [0, 0, 1, 1], [], []>} : vector<8x4xbf16>, vector<4x256xbf16>, vector<8x256xf32> -> vector<8x256xf32>
      %27 = vector.extract_strided_slice %16 {offsets = [0, 240], sizes = [4, 16], strides = [1, 1]} : vector<4x256xf32> to vector<4x16xf32>
      %28 = vector.extract_strided_slice %16 {offsets = [0, 0], sizes = [4, 240], strides = [1, 1]} : vector<4x256xf32> to vector<4x240xf32>
      %29 = tpu.concatenate %27, %28 in 1 : vector<4x16xf32>, vector<4x240xf32> -> vector<4x256xf32>
      %30 = arith.truncf %29 : vector<4x256xf32> to vector<4x256xbf16>
      %31 = vector.extract_strided_slice %14 {offsets = [1, 0], sizes = [1, 256], strides = [1, 1]} : vector<9x256xbf16> to vector<1x256xbf16>
      %32 = vector.broadcast %31 : vector<1x256xbf16> to vector<4x256xbf16>
      %33 = arith.mulf %30, %32 : vector<4x256xbf16>
      %c1 = arith.constant 1 : index
      %c0_13 = arith.constant 0 : index
      %c0_14 = arith.constant 0 : index
      %34 = vector.load %arg3[%c1, %c0_13, %c0_14] : memref<9x8x4xbf16, #tpu.memory_space<vmem>>, vector<1x8x4xbf16>
      %35 = vector.shape_cast %34 : vector<1x8x4xbf16> to vector<8x4xbf16>
      %cst_15 = arith.constant dense<0.000000e+00> : vector<8x256xf32>
      %36 = tpu.matmul %35, %33, %cst_15 {dimension_numbers = #tpu.dot_dimension_numbers<[1], [0], [0], [1], [0, 0, 1, 1], [], []>} : vector<8x4xbf16>, vector<4x256xbf16>, vector<8x256xf32> -> vector<8x256xf32>
      %37 = arith.addf %26, %36 : vector<8x256xf32>
      %38 = vector.extract_strided_slice %16 {offsets = [0, 241], sizes = [4, 15], strides = [1, 1]} : vector<4x256xf32> to vector<4x15xf32>
      %39 = vector.extract_strided_slice %16 {offsets = [0, 0], sizes = [4, 241], strides = [1, 1]} : vector<4x256xf32> to vector<4x241xf32>
      %40 = tpu.concatenate %38, %39 in 1 : vector<4x15xf32>, vector<4x241xf32> -> vector<4x256xf32>
      %41 = arith.truncf %40 : vector<4x256xf32> to vector<4x256xbf16>
      %42 = vector.extract_strided_slice %14 {offsets = [2, 0], sizes = [1, 256], strides = [1, 1]} : vector<9x256xbf16> to vector<1x256xbf16>
      %43 = vector.broadcast %42 : vector<1x256xbf16> to vector<4x256xbf16>
      %44 = arith.mulf %41, %43 : vector<4x256xbf16>
      %c2 = arith.constant 2 : index
      %c0_16 = arith.constant 0 : index
      %c0_17 = arith.constant 0 : index
      %45 = vector.load %arg3[%c2, %c0_16, %c0_17] : memref<9x8x4xbf16, #tpu.memory_space<vmem>>, vector<1x8x4xbf16>
      %46 = vector.shape_cast %45 : vector<1x8x4xbf16> to vector<8x4xbf16>
      %cst_18 = arith.constant dense<0.000000e+00> : vector<8x256xf32>
      %47 = tpu.matmul %46, %44, %cst_18 {dimension_numbers = #tpu.dot_dimension_numbers<[1], [0], [0], [1], [0, 0, 1, 1], [], []>} : vector<8x4xbf16>, vector<4x256xbf16>, vector<8x256xf32> -> vector<8x256xf32>
      %48 = arith.addf %37, %47 : vector<8x256xf32>
      %49 = vector.extract_strided_slice %16 {offsets = [0, 255], sizes = [4, 1], strides = [1, 1]} : vector<4x256xf32> to vector<4x1xf32>
      %50 = vector.extract_strided_slice %16 {offsets = [0, 0], sizes = [4, 255], strides = [1, 1]} : vector<4x256xf32> to vector<4x255xf32>
      %51 = tpu.concatenate %49, %50 in 1 : vector<4x1xf32>, vector<4x255xf32> -> vector<4x256xf32>
      %52 = arith.truncf %51 : vector<4x256xf32> to vector<4x256xbf16>
      %53 = vector.extract_strided_slice %14 {offsets = [3, 0], sizes = [1, 256], strides = [1, 1]} : vector<9x256xbf16> to vector<1x256xbf16>
      %54 = vector.broadcast %53 : vector<1x256xbf16> to vector<4x256xbf16>
      %55 = arith.mulf %52, %54 : vector<4x256xbf16>
      %c3 = arith.constant 3 : index
      %c0_19 = arith.constant 0 : index
      %c0_20 = arith.constant 0 : index
      %56 = vector.load %arg3[%c3, %c0_19, %c0_20] : memref<9x8x4xbf16, #tpu.memory_space<vmem>>, vector<1x8x4xbf16>
      %57 = vector.shape_cast %56 : vector<1x8x4xbf16> to vector<8x4xbf16>
      %cst_21 = arith.constant dense<0.000000e+00> : vector<8x256xf32>
      %58 = tpu.matmul %57, %55, %cst_21 {dimension_numbers = #tpu.dot_dimension_numbers<[1], [0], [0], [1], [0, 0, 1, 1], [], []>} : vector<8x4xbf16>, vector<4x256xbf16>, vector<8x256xf32> -> vector<8x256xf32>
      %59 = arith.addf %48, %58 : vector<8x256xf32>
      %60 = arith.truncf %16 : vector<4x256xf32> to vector<4x256xbf16>
      %c4 = arith.constant 4 : index
      %c0_22 = arith.constant 0 : index
      %c0_23 = arith.constant 0 : index
      %61 = vector.load %arg3[%c4, %c0_22, %c0_23] : memref<9x8x4xbf16, #tpu.memory_space<vmem>>, vector<1x8x4xbf16>
      %62 = vector.shape_cast %61 : vector<1x8x4xbf16> to vector<8x4xbf16>
      %cst_24 = arith.constant dense<0.000000e+00> : vector<8x256xf32>
      %63 = tpu.matmul %62, %60, %cst_24 {dimension_numbers = #tpu.dot_dimension_numbers<[1], [0], [0], [1], [0, 0, 1, 1], [], []>} : vector<8x4xbf16>, vector<4x256xbf16>, vector<8x256xf32> -> vector<8x256xf32>
      %64 = arith.addf %59, %63 : vector<8x256xf32>
      %65 = vector.extract_strided_slice %16 {offsets = [0, 1], sizes = [4, 255], strides = [1, 1]} : vector<4x256xf32> to vector<4x255xf32>
      %66 = vector.extract_strided_slice %16 {offsets = [0, 0], sizes = [4, 1], strides = [1, 1]} : vector<4x256xf32> to vector<4x1xf32>
      %67 = tpu.concatenate %65, %66 in 1 : vector<4x255xf32>, vector<4x1xf32> -> vector<4x256xf32>
      %68 = arith.truncf %67 : vector<4x256xf32> to vector<4x256xbf16>
      %69 = vector.extract_strided_slice %14 {offsets = [5, 0], sizes = [1, 256], strides = [1, 1]} : vector<9x256xbf16> to vector<1x256xbf16>
      %70 = vector.broadcast %69 : vector<1x256xbf16> to vector<4x256xbf16>
      %71 = arith.mulf %68, %70 : vector<4x256xbf16>
      %c5 = arith.constant 5 : index
      %c0_25 = arith.constant 0 : index
      %c0_26 = arith.constant 0 : index
      %72 = vector.load %arg3[%c5, %c0_25, %c0_26] : memref<9x8x4xbf16, #tpu.memory_space<vmem>>, vector<1x8x4xbf16>
      %73 = vector.shape_cast %72 : vector<1x8x4xbf16> to vector<8x4xbf16>
      %cst_27 = arith.constant dense<0.000000e+00> : vector<8x256xf32>
      %74 = tpu.matmul %73, %71, %cst_27 {dimension_numbers = #tpu.dot_dimension_numbers<[1], [0], [0], [1], [0, 0, 1, 1], [], []>} : vector<8x4xbf16>, vector<4x256xbf16>, vector<8x256xf32> -> vector<8x256xf32>
      %75 = arith.addf %64, %74 : vector<8x256xf32>
      %76 = vector.extract_strided_slice %16 {offsets = [0, 15], sizes = [4, 241], strides = [1, 1]} : vector<4x256xf32> to vector<4x241xf32>
      %77 = vector.extract_strided_slice %16 {offsets = [0, 0], sizes = [4, 15], strides = [1, 1]} : vector<4x256xf32> to vector<4x15xf32>
      %78 = tpu.concatenate %76, %77 in 1 : vector<4x241xf32>, vector<4x15xf32> -> vector<4x256xf32>
      %79 = arith.truncf %78 : vector<4x256xf32> to vector<4x256xbf16>
      %80 = vector.extract_strided_slice %14 {offsets = [6, 0], sizes = [1, 256], strides = [1, 1]} : vector<9x256xbf16> to vector<1x256xbf16>
      %81 = vector.broadcast %80 : vector<1x256xbf16> to vector<4x256xbf16>
      %82 = arith.mulf %79, %81 : vector<4x256xbf16>
      %c6 = arith.constant 6 : index
      %c0_28 = arith.constant 0 : index
      %c0_29 = arith.constant 0 : index
      %83 = vector.load %arg3[%c6, %c0_28, %c0_29] : memref<9x8x4xbf16, #tpu.memory_space<vmem>>, vector<1x8x4xbf16>
      %84 = vector.shape_cast %83 : vector<1x8x4xbf16> to vector<8x4xbf16>
      %cst_30 = arith.constant dense<0.000000e+00> : vector<8x256xf32>
      %85 = tpu.matmul %84, %82, %cst_30 {dimension_numbers = #tpu.dot_dimension_numbers<[1], [0], [0], [1], [0, 0, 1, 1], [], []>} : vector<8x4xbf16>, vector<4x256xbf16>, vector<8x256xf32> -> vector<8x256xf32>
      %86 = arith.addf %75, %85 : vector<8x256xf32>
      %87 = vector.extract_strided_slice %16 {offsets = [0, 16], sizes = [4, 240], strides = [1, 1]} : vector<4x256xf32> to vector<4x240xf32>
      %88 = vector.extract_strided_slice %16 {offsets = [0, 0], sizes = [4, 16], strides = [1, 1]} : vector<4x256xf32> to vector<4x16xf32>
      %89 = tpu.concatenate %87, %88 in 1 : vector<4x240xf32>, vector<4x16xf32> -> vector<4x256xf32>
      %90 = arith.truncf %89 : vector<4x256xf32> to vector<4x256xbf16>
      %91 = vector.extract_strided_slice %14 {offsets = [7, 0], sizes = [1, 256], strides = [1, 1]} : vector<9x256xbf16> to vector<1x256xbf16>
      %92 = vector.broadcast %91 : vector<1x256xbf16> to vector<4x256xbf16>
      %93 = arith.mulf %90, %92 : vector<4x256xbf16>
      %c7 = arith.constant 7 : index
      %c0_31 = arith.constant 0 : index
      %c0_32 = arith.constant 0 : index
      %94 = vector.load %arg3[%c7, %c0_31, %c0_32] : memref<9x8x4xbf16, #tpu.memory_space<vmem>>, vector<1x8x4xbf16>
      %95 = vector.shape_cast %94 : vector<1x8x4xbf16> to vector<8x4xbf16>
      %cst_33 = arith.constant dense<0.000000e+00> : vector<8x256xf32>
      %96 = tpu.matmul %95, %93, %cst_33 {dimension_numbers = #tpu.dot_dimension_numbers<[1], [0], [0], [1], [0, 0, 1, 1], [], []>} : vector<8x4xbf16>, vector<4x256xbf16>, vector<8x256xf32> -> vector<8x256xf32>
      %97 = arith.addf %86, %96 : vector<8x256xf32>
      %98 = vector.extract_strided_slice %16 {offsets = [0, 17], sizes = [4, 239], strides = [1, 1]} : vector<4x256xf32> to vector<4x239xf32>
      %99 = vector.extract_strided_slice %16 {offsets = [0, 0], sizes = [4, 17], strides = [1, 1]} : vector<4x256xf32> to vector<4x17xf32>
      %100 = tpu.concatenate %98, %99 in 1 : vector<4x239xf32>, vector<4x17xf32> -> vector<4x256xf32>
      %101 = arith.truncf %100 : vector<4x256xf32> to vector<4x256xbf16>
      %102 = vector.extract_strided_slice %14 {offsets = [8, 0], sizes = [1, 256], strides = [1, 1]} : vector<9x256xbf16> to vector<1x256xbf16>
      %103 = vector.broadcast %102 : vector<1x256xbf16> to vector<4x256xbf16>
      %104 = arith.mulf %101, %103 : vector<4x256xbf16>
      %c8 = arith.constant 8 : index
      %c0_34 = arith.constant 0 : index
      %c0_35 = arith.constant 0 : index
      %105 = vector.load %arg3[%c8, %c0_34, %c0_35] : memref<9x8x4xbf16, #tpu.memory_space<vmem>>, vector<1x8x4xbf16>
      %106 = vector.shape_cast %105 : vector<1x8x4xbf16> to vector<8x4xbf16>
      %cst_36 = arith.constant dense<0.000000e+00> : vector<8x256xf32>
      %107 = tpu.matmul %106, %104, %cst_36 {dimension_numbers = #tpu.dot_dimension_numbers<[1], [0], [0], [1], [0, 0, 1, 1], [], []>} : vector<8x4xbf16>, vector<4x256xbf16>, vector<8x256xf32> -> vector<8x256xf32>
      %108 = arith.addf %97, %107 : vector<8x256xf32>
      %109 = arith.truncf %108 : vector<8x256xf32> to vector<8x256xbf16>
      %c1_i32_37 = arith.constant 1 : i32
      %110 = arith.muli %arg1, %c1_i32_37 : i32
      %c0_i32_38 = arith.constant 0 : i32
      %111 = arith.addi %110, %c0_i32_38 : i32
      %112 = arith.index_cast %111 : i32 to index
      %c0_39 = arith.constant 0 : index
      %c0_40 = arith.constant 0 : index
      %113 = vector.load %arg8[%112, %c0_39, %c0_40] : memref<2x8x256xbf16, #tpu.memory_space<vmem>>, vector<1x8x256xbf16>
      %114 = vector.shape_cast %113 : vector<1x8x256xbf16> to vector<8x256xbf16>
      %115 = vector.shape_cast %109 : vector<8x256xbf16> to vector<1x8x256xbf16>
      tpu.vector_store %arg8[%112, %c0_39, %c0_40], %115 {strides = array<i32>} : memref<2x8x256xbf16, #tpu.memory_space<vmem>>, vector<1x8x256xbf16>,
      %c0_41 = arith.constant 0 : index
      %c0_42 = arith.constant 0 : index
      %116 = vector.load %arg9[%c0_41, %c0_42] : memref<8x1xf32, #tpu.memory_space<vmem>>, vector<8x1xf32>
      %cst_43 = arith.constant dense<0.000000e+00> : vector<8xf32>
      %117 = vector.multi_reduction <add>, %108, %cst_43 [1] : vector<8x256xf32> to vector<8xf32>
      %118 = vector.shape_cast %117 : vector<8xf32> to vector<8x1xf32>
      %119 = arith.addf %116, %118 : vector<8x1xf32>
      %c0_44 = arith.constant 0 : index
      %c0_45 = arith.constant 0 : index
      %120 = vector.load %arg9[%c0_44, %c0_45] : memref<8x1xf32, #tpu.memory_space<vmem>>, vector<8x1xf32>
      tpu.vector_store %arg9[%c0_44, %c0_45], %119 {strides = array<i32>} : memref<8x1xf32, #tpu.memory_space<vmem>>, vector<8x1xf32>,
    } else {
    }
    %c1_i32 = arith.constant 1 : i32
    %8 = arith.cmpi eq, %arg0, %c1_i32 : i32
    %9 = arith.extui %8 : i1 to i32
    %c0_i32_4 = arith.constant 0 : i32
    %10 = arith.cmpi ne, %9, %c0_i32_4 : i32
    scf.if %10 {
      %c0 = arith.constant 0 : index
      %c0_6 = arith.constant 0 : index
      %14 = vector.load %arg9[%c0, %c0_6] : memref<8x1xf32, #tpu.memory_space<vmem>>, vector<8x1xf32>
      %cst = arith.constant 0.001953125 : f32
      %15 = vector.broadcast %cst : f32 to vector<8x1xf32>
      %16 = arith.mulf %14, %15 : vector<8x1xf32>
      %c1_i32_7 = arith.constant 1 : i32
      %17 = arith.muli %arg1, %c1_i32_7 : i32
      %c0_i32_8 = arith.constant 0 : i32
      %18 = arith.addi %17, %c0_i32_8 : i32
      %19 = arith.index_cast %18 : i32 to index
      %c0_9 = arith.constant 0 : index
      %c0_10 = arith.constant 0 : index
      %20 = vector.load %arg8[%19, %c0_9, %c0_10] : memref<2x8x256xbf16, #tpu.memory_space<vmem>>, vector<1x8x256xbf16>
      %21 = vector.shape_cast %20 : vector<1x8x256xbf16> to vector<8x256xbf16>
      %22 = arith.extf %21 : vector<8x256xbf16> to vector<8x256xf32>
      %23 = vector.broadcast %16 : vector<8x1xf32> to vector<8x256xf32>
      %24 = arith.subf %22, %23 : vector<8x256xf32>
      %c0_11 = arith.constant 0 : index
      %c0_12 = arith.constant 0 : index
      %25 = vector.load %arg10[%c0_11, %c0_12] : memref<8x1xf32, #tpu.memory_space<vmem>>, vector<8x1xf32>
      %26 = arith.mulf %24, %24 : vector<8x256xf32>
      %cst_13 = arith.constant dense<0.000000e+00> : vector<8xf32>
      %27 = vector.multi_reduction <add>, %26, %cst_13 [1] : vector<8x256xf32> to vector<8xf32>
      %28 = vector.shape_cast %27 : vector<8xf32> to vector<8x1xf32>
      %29 = arith.addf %25, %28 : vector<8x1xf32>
      %c0_14 = arith.constant 0 : index
      %c0_15 = arith.constant 0 : index
      %30 = vector.load %arg10[%c0_14, %c0_15] : memref<8x1xf32, #tpu.memory_space<vmem>>, vector<8x1xf32>
      tpu.vector_store %arg10[%c0_14, %c0_15], %29 {strides = array<i32>} : memref<8x1xf32, #tpu.memory_space<vmem>>, vector<8x1xf32>,
    } else {
    }
    %c2_i32 = arith.constant 2 : i32
    %11 = arith.cmpi eq, %arg0, %c2_i32 : i32
    %12 = arith.extui %11 : i1 to i32
    %c0_i32_5 = arith.constant 0 : i32
    %13 = arith.cmpi ne, %12, %c0_i32_5 : i32
    scf.if %13 {
      %c0 = arith.constant 0 : index
      %c0_6 = arith.constant 0 : index
      %14 = vector.load %arg9[%c0, %c0_6] : memref<8x1xf32, #tpu.memory_space<vmem>>, vector<8x1xf32>
      %cst = arith.constant 0.001953125 : f32
      %15 = vector.broadcast %cst : f32 to vector<8x1xf32>
      %16 = arith.mulf %14, %15 : vector<8x1xf32>
      %c0_7 = arith.constant 0 : index
      %c0_8 = arith.constant 0 : index
      %17 = vector.load %arg10[%c0_7, %c0_8] : memref<8x1xf32, #tpu.memory_space<vmem>>, vector<8x1xf32>
      %cst_9 = arith.constant 0.001953125 : f32
      %18 = vector.broadcast %cst_9 : f32 to vector<8x1xf32>
      %19 = arith.mulf %17, %18 : vector<8x1xf32>
      %c0_10 = arith.constant 0 : index
      %c0_11 = arith.constant 0 : index
      %20 = vector.load %arg5[%c0_10, %c0_11] : memref<8x1xf32, #tpu.memory_space<vmem>>, vector<8x1xf32>
      %cst_12 = arith.constant 1.000000e-03 : f32
      %21 = vector.broadcast %cst_12 : f32 to vector<8x1xf32>
      %22 = arith.addf %19, %21 : vector<8x1xf32>
      %23 = math.rsqrt %22 : vector<8x1xf32>
      %24 = arith.mulf %20, %23 : vector<8x1xf32>
      %c0_13 = arith.constant 0 : index
      %c0_14 = arith.constant 0 : index
      %25 = vector.load %arg6[%c0_13, %c0_14] : memref<8x1xf32, #tpu.memory_space<vmem>>, vector<8x1xf32>
      %26 = arith.mulf %16, %24 : vector<8x1xf32>
      %27 = arith.subf %25, %26 : vector<8x1xf32>
      %c1_i32_15 = arith.constant 1 : i32
      %28 = arith.muli %arg1, %c1_i32_15 : i32
      %c0_i32_16 = arith.constant 0 : i32
      %29 = arith.addi %28, %c0_i32_16 : i32
      %30 = arith.index_cast %29 : i32 to index
      %c0_17 = arith.constant 0 : index
      %c0_18 = arith.constant 0 : index
      %31 = vector.load %arg8[%30, %c0_17, %c0_18] : memref<2x8x256xbf16, #tpu.memory_space<vmem>>, vector<1x8x256xbf16>
      %32 = vector.shape_cast %31 : vector<1x8x256xbf16> to vector<8x256xbf16>
      %33 = arith.extf %32 : vector<8x256xbf16> to vector<8x256xf32>
      %34 = vector.broadcast %24 : vector<8x1xf32> to vector<8x256xf32>
      %35 = arith.mulf %33, %34 : vector<8x256xf32>
      %36 = vector.broadcast %27 : vector<8x1xf32> to vector<8x256xf32>
      %37 = arith.addf %35, %36 : vector<8x256xf32>
      %cst_19 = arith.constant 0.000000e+00 : f32
      %38 = vector.broadcast %cst_19 : f32 to vector<8x256xf32>
      %39 = arith.maximumf %37, %38 : vector<8x256xf32>
      %c0_20 = arith.constant 0 : index
      %c0_21 = arith.constant 0 : index
      %c0_22 = arith.constant 0 : index
      %40 = vector.load %arg7[%c0_20, %c0_21, %c0_22] : memref<1x8x256xf32, #tpu.memory_space<vmem>>, vector<1x8x256xf32>
      %41 = vector.shape_cast %40 : vector<1x8x256xf32> to vector<8x256xf32>
      %42 = vector.shape_cast %39 : vector<8x256xf32> to vector<1x8x256xf32>
      tpu.vector_store %arg7[%c0_20, %c0_21, %c0_22], %42 {strides = array<i32>} : memref<1x8x256xf32, #tpu.memory_space<vmem>>, vector<1x8x256xf32>,
    } else {
    }
    return
  }
  func.func @transform_0(%arg0: i32, %arg1: i32) -> (i32, i32, i32) {
    %c0_i32 = arith.constant 0 : i32
    %0 = arith.cmpi eq, %arg0, %c0_i32 : i32
    %c1_i32 = arith.constant 1 : i32
    %1 = arith.select %0, %arg1, %c1_i32 : i32
    %c0_i32_0 = arith.constant 0 : i32
    %c0_i32_1 = arith.constant 0 : i32
    %c0_i32_2 = arith.constant 0 : i32
    return %1, %c0_i32_0, %c0_i32_1 : i32, i32, i32
  }
  func.func @transform_1(%arg0: i32, %arg1: i32) -> (i32, i32, i32) {
    %c0_i32 = arith.constant 0 : i32
    %c0_i32_0 = arith.constant 0 : i32
    %c0_i32_1 = arith.constant 0 : i32
    %c0_i32_2 = arith.constant 0 : i32
    return %c0_i32, %c0_i32_0, %c0_i32_1 : i32, i32, i32
  }
  func.func @transform_2(%arg0: i32, %arg1: i32) -> (i32, i32) {
    %c0_i32 = arith.constant 0 : i32
    %c0_i32_0 = arith.constant 0 : i32
    %c0_i32_1 = arith.constant 0 : i32
    return %c0_i32, %c0_i32_0 : i32, i32
  }
  func.func @transform_3(%arg0: i32, %arg1: i32) -> (i32, i32) {
    %c0_i32 = arith.constant 0 : i32
    %c0_i32_0 = arith.constant 0 : i32
    %c0_i32_1 = arith.constant 0 : i32
    return %c0_i32, %c0_i32_0 : i32, i32
  }
  func.func @transform_4(%arg0: i32, %arg1: i32) -> (i32, i32) {
    %c0_i32 = arith.constant 0 : i32
    %c0_i32_0 = arith.constant 0 : i32
    %c0_i32_1 = arith.constant 0 : i32
    return %c0_i32, %c0_i32_0 : i32, i32
  }
  func.func @transform_5(%arg0: i32, %arg1: i32) -> (i32, i32, i32) {
    %c2_i32 = arith.constant 2 : i32
    %0 = arith.cmpi eq, %arg0, %c2_i32 : i32
    %c0_i32 = arith.constant 0 : i32
    %1 = arith.select %0, %arg1, %c0_i32 : i32
    %c0_i32_0 = arith.constant 0 : i32
    %c0_i32_1 = arith.constant 0 : i32
    %c0_i32_2 = arith.constant 0 : i32
    return %1, %c0_i32_0, %c0_i32_1 : i32, i32, i32
  }
}

</mosaic_0001>

<bundles_post_ra>
// kernel: tpu_custom_call.1
= control target key start
LH: loop header
LB: loop body
LE: loop exit
PB: predicated region body
PF: predicated region fallthrough
CT: control target
= control target key end

     0   :  { %s1640_s0 = inlined_call_operand.vmem [shape: f32[2,4,256], index: 0, kind: input, shape index: {}]   ;;  %s1641_s1 = inlined_call_operand.vmem [shape: bf16[9,8,4], index: 1, kind: input, shape index: {}]   ;;  %s1642_s2 = inlined_call_operand.vmem [shape: bf16[9,256], index: 2, kind: input, shape index: {}]   ;;  %s1643_s3 = inlined_call_operand.vmem [shape: f32[8,1], index: 3, kind: input, shape index: {}]   ;;  %s1644_s4 = inlined_call_operand.vmem [shape: f32[8,1], index: 4, kind: input, shape index: {}]   ;;  %s1645_s5 = inlined_call_operand.hbm [shape: f32[2,8,256], index: 5, kind: output, shape index: {}]  }
   0x1   :  { %1646 = sst [smem:[#allocation8_spill]] %s1640_s0 }
   0x2   :  { %10 = vsyncpa [#allocation6], 0 }
   0x3   :  { %12 = vsyncpa [#allocation6 + $0x1], 0  ;;  %s1377_s18 = smov 0   ;;  %s1379_s19 = smov 0  }
   0x4   :  { %s1381_s20 = smov 0   ;;  %s1383_s21 = smov 0  }
   0x5   :  { %s1385_s22 = smov 0   ;;  %s1387_s23 = smov 0  }
   0x6   :  { %s1389_s24 = smov 0   ;;  %s1391_s25 = smov 0  }
   0x7 LB: > { %s1061_s26 = sadd.s32 4294967295, %s1334_s25   ;;  %s27_s27 = sadd.s32 1, %s1326_s23  ;;  %s1334_s25 = sphi %s1391_s25, %s18_s25   ;;  %s1330_s24 = sphi %s1389_s24, %s1656_s24   ;;  %s1326_s23 = sphi %s1387_s23, %s1655_s23   ;;  %s1322_s22 = sphi %s1385_s22, %s1654_s22   ;;  %s1318_s21 = sphi %s1383_s21, %s1653_s21   ;;  %s1314_s20 = sphi %s1381_s20, %s1652_s20   ;;  %s1310_s19 = sphi %s1379_s19, %s1651_s19   ;;  %s1306_s18 = sphi %s1377_s18, %s1650_s18  }
   0x8   : > { %s30_s28 = sadd.s32 1, %s1330_s24  ;;  %p28_p0 = scmp.ge.s32.totalorder %s27_s27, 2 }
   0x9   : > { %p148_p1 = scmp.eq.s32.totalorder %s1330_s24, 2  ;;  %s1062_s29 = sadd.s32 4294967294, %s1334_s25  }
   0xa   : > { %p165_p2 = scmp.ne.s32.totalorder %s1314_s20, %s1310_s19  ;;  %s1658_s27 = smov (%p28_p0, %s27_s27), 0 }
   0xb   : > { %s1660_s28 = smov (!%p28_p0, %s30_s28), %s1330_s24  ;;  %p166_p4 = scmp.eq.s32.totalorder %s1061_s26, 5 }
   0xc   : > { %s149_s30 = scalar_select %p148_p1, %s1326_s23, 0 }
   0xd   : > { %p32_p3 = scmp.ge.s32.totalorder %s1660_s28, 3  ;;  %p171_p5 = scmp.ne.s32.totalorder %s1310_s19, %s1306_s18 }
   0xe   : > { %p172_p6 = scmp.eq.s32.totalorder %s1062_s29, 5  ;;  %p1432_p7 = por %p166_p4, %p165_p2 }
   0xf   : > { %s1662_s28 = smov (%p32_p3, %s1660_s28), 0  ;;  %p1065_p10 = scmp.ge.s32.totalorder %s1334_s25, 1 }
  0x10   : > { %p1436_p8 = por %p172_p6, %p171_p5  ;;  %p150_p9 = scmp.eq.s32.totalorder %s1662_s28, 2 }
  0x11   : > { %p214_p11 = scmp.lt.s32.totalorder %s1334_s25, 7  ;;  %s155_s10 = sadd.s32 1, %s1314_s20 }
  0x12   : > { %s151_s8 = scalar_select %p150_p9, %s1658_s27, 0 }
  0x13   : > { %p215_p12 = pnand %p1065_p10, %p214_p11 }
  0x14   : > { %s152_s9 = ssub.s32 %s149_s30, %s151_s8  ;;  %s241_s12 = sand.u32 (!%p215_p12), 1, %s1310_s19  }
  0x15   : > { %p153_p13 = scmp.eq.s32.totalorder %s152_s9, 0  ;;  %218 = sbr.rel (%p215_p12) target bundleno = 987 (0x3db), region = 40 }
  0x16   : > { %p244_p0 = scmp.eq.s32.totalorder (!%p215_p12), %s1322_s22, 0  ;;  %s1066_s13 = sshll.u32 (!%p215_p12), %s241_s12, 4 }
  0x17   : > { %s1446_s11 = scalar_select %p153_p13, %s1314_s20, %s155_s10  }
  0x18   : > { %p257_p1 = scmp.eq.s32.totalorder (!%p215_p12), %s1318_s21, 0  ;;  %s1649_s0 = sld [smem:[#allocation8_spill]] (!%p215_p12) }
  0x19   : > { %s1457_s29 = scalar_lea.vmem (!%p215_p12), [#allocation5], %s1066_s13 }
  0x1a   : > { %s245_s14 = scalar_select %p244_p0, %s1318_s21, 1 }
  0x1b   : > { %p258_p2 = pnand %p257_p1, %p244_p0 }
  0x1c   : > { %p246_p3 = scmp.lt.s32.totalorder %s245_s14, 1 }
  0x1d   : > { %261 = sbr.rel (%p258_p2) target bundleno = 37 (0x25), region = 44 }
  0x1e   : > { %s1664_s14 = smov (!%p246_p3, %s245_s14), 1 }
  0x1f   : > { %s1109_s15 = sshll.u32 %s1664_s14, 3 }
  0x20   : > { %s250_s26 = scalar_lea.vmem %s1649_s0, %s1109_s15 }
  0x22   : > { %vm262_vm0 = vcmask 7168   ;;  %v1336_v0 = vmov 0.0  }
  0x23   : > { %263 = vst.msk [vmem:[#allocation3] sm:$0xff] %vm262_vm0, %v1336_v0 }
  0x24   : > { %264 = vst.msk [vmem:[#allocation4] sm:$0xff] %vm262_vm0, %v1336_v0 }
  0x25 PF: > { %p1069_p4 = scmp.ne.s32.totalorder %s1322_s22, 0 }
  0x26   : > { %s1337_s30 = smov (!%p1069_p4), 17   ;;  %s1338_s8 = smov (!%p1069_p4), 16  }
  0x27   : > { %267 = sbr.rel (%p1069_p4) target bundleno = 558 (0x22e), region = 48  ;;  %s1339_s9 = smov (!%p1069_p4), 15  }
  0x28   : > { %s1340_s10 = smov (!%p1069_p4), 1   ;;  %s1341_s13 = smov (!%p1069_p4), 127  }
  0x29   : > { %s1342_s14 = smov (!%p1069_p4), 113   ;;  %s1343_s15 = smov (!%p1069_p4), 112  }
  0x2c   : > { %v1460_v1 = vld [vmem:[%s250_s26] sm:$0xff]  ;;  %s1344_s26 = smov 111   ;;  %vm284_vm1 = vcmask 138240   ;;  %vm432_vm2 = vcmask 121856   ;;  %vm352_vm3 = vcmask 1041408   ;;  %vm324_vm4 = vcmask 130048  }
  0x2d   : > { %272 = vst [vmem:[#allocation1] ss:$2 sm:$0xff] %v1460_v1  ;;  %v268_v32 = vld [vmem:[%s1642_s2] sm:$0xff]  ;;  %vm348_vm5 = vcmask 31744   ;;  %vm499_vm6 = vcmask 7168   ;;  %vm607_vm7 = vcmask 1039360  }
  0x2e   : > { %v291_v36 = vunpack.c.l.b16 %v268_v32  ;;  %v292_v37 = vunpack.c.h.b16 %v268_v32  ;;  %vm674_vm8 = vcmask 924672   ;;  %vm741_vm9 = vcmask 916480  }
  0x2f   : > { %vm808_vm10 = vcmask 908288  }
  0x30   : > { %v293_v39 = vpack.c.b16 %v291_v36, %v291_v36  ;;  %v294_v40 = vpack.c.b16 %v292_v37, %v292_v37 }
  0x32   : > { %v1486_v44 = vpack.i.b16 %v293_v39, %v293_v39  ;;  %v1488_v45 = vpack.i.b16 %v294_v40, %v294_v40  ;;  %v330_v57 = vshrl.u32 %v293_v39, 16  ;;  %v334_v60 = vshrl.u32 %v294_v40, 16 }
  0x34   : > { %v273_v2 = vld.sshfl [vmem:[#allocation1 + $0x8] sm:$0xff pattern:$0x75316420]  ;;  %v298_v46 = vperm.slane %v1486_v44, 0  ;;  %v302_v47 = vperm.slane %v1488_v45, 0 }
  0x35   : > { %277 = vst [vmem:[#allocation1] ss:$2 sm:$0xff] %v1460_v1 }
  0x36   : > { %v305_v53 = vunpack.c.l.bf16 %v298_v46  ;;  %v306_v54 = vunpack.c.l.bf16 %v302_v47 }
  0x3c   : > { %v278_v3 = vld.sshfl [vmem:[#allocation1] sm:$0xff pattern:$0x75316420]  ;;  %v279_v4 = vld.sshfl [vmem:[#allocation1 + $0x8] sm:$0xff pattern:$0x75316420] }
  0x3d   : > { %312 = vst [vmem:[#allocation1] ss:$2 sm:$0xff] %v1460_v1  ;;  %v1201_v5 = vpack.i.bf16 %v278_v3, %v273_v2 }
  0x3f   : > { %1202 = vrot.lane.b32.xlu1 %v1201_v5, %s1337_s30 }
  0x44   : > { %v313_v6 = vld.sshfl [vmem:[#allocation1 + $0x8] sm:$0xff pattern:$0x75316420] }
  0x45   : > { %317 = vst [vmem:[#allocation1] ss:$2 sm:$0xff] %v1460_v1 }
  0x47   : > { %282 = vrot.lane.b32.xlu1 %v279_v4, %s1337_s30  ;;  %s1110_s30 = sshll.u32 %s1318_s21, 3 }
  0x4c   : > { %v318_v7 = vld.sshfl [vmem:[#allocation1] sm:$0xff pattern:$0x75316420]  ;;  %v319_v8 = vld.sshfl [vmem:[#allocation1 + $0x8] sm:$0xff pattern:$0x75316420] }
  0x4d   : > { %v1196_v9 = vpack.i.bf16 %v318_v7, %v313_v6  ;;  %420 = vst [vmem:[#allocation1] ss:$2 sm:$0xff] %v1460_v1  ;;  %v438_v6 = vperm.slane %v1486_v44, 1  ;;  %v439_v7 = vperm.slane %v1488_v45, 1 }
  0x4f   : > { %1197 = vrot.lane.b32.xlu0 %v1196_v9, %s1338_s8 }
  0x54   : > { %v421_v10 = vld.sshfl [vmem:[#allocation1 + $0x8] sm:$0xff pattern:$0x75316420] }
  0x55   : > { %425 = vst [vmem:[#allocation1] ss:$2 sm:$0xff] %v1460_v1 }
  0x57   : > { %322 = vrot.lane.b32.xlu0 %v319_v8, %s1338_s8  ;;  %v1496_v8 = vpack.i.b16 %v334_v60, %v334_v60  ;;  %s882_s8 = scalar_lea.vmem [#allocation2], %s1110_s30 }
  0x5c   : > { %v426_v11 = vld.sshfl [vmem:[#allocation1] sm:$0xff pattern:$0x75316420]  ;;  %v427_v12 = vld.sshfl [vmem:[#allocation1 + $0x8] sm:$0xff pattern:$0x75316420] }
  0x5d   : > { %487 = vst [vmem:[#allocation1] ss:$2 sm:$0xff] %v1460_v1  ;;  %v1206_v13 = vpack.i.bf16 %v426_v11, %v421_v10 }
  0x5f   : > { %1207 = vrot.lane.b32.xlu2 %v1206_v13, %s1339_s9 }
  0x64   : > { %v488_v14 = vld.sshfl [vmem:[#allocation1 + $0x8] sm:$0xff pattern:$0x75316420] }
  0x65   : > { %492 = vst [vmem:[#allocation1] ss:$2 sm:$0xff] %v1460_v1 }
  0x67   : > { %430 = vrot.lane.b32.xlu2 %v427_v12, %s1339_s9 }
  0x6c   : > { %v493_v15 = vld.sshfl [vmem:[#allocation1] sm:$0xff pattern:$0x75316420]  ;;  %v494_v16 = vld.sshfl [vmem:[#allocation1 + $0x8] sm:$0xff pattern:$0x75316420] }
  0x6d   : > { %v1211_v17 = vpack.i.bf16 %v493_v15, %v488_v14  ;;  %497 = vrot.lane.b32.xlu1 %v494_v16, %s1340_s10  ;;  %554 = vst [vmem:[#allocation1] ss:$2 sm:$0xff] %v1460_v1  ;;  %v311_v14 = vld [vmem:[%s1641_s1] sm:$0xf] }
  0x6f   : > { %1212 = vrot.lane.b32.xlu0 %v1211_v17, %s1340_s10  ;;  %v442_v17 = vunpack.c.l.bf16 %v438_v6 }
  0x74   : > { %v1471_v18 = vld.sshfl [vmem:[#allocation1] sm:$0xff pattern:$0x75316420]  ;;  %v1473_v19 = vld.sshfl [vmem:[#allocation1 + $0x8] sm:$0xff pattern:$0x75316420] }
  0x75   : > { %600 = vst [vmem:[#allocation1] ss:$2 sm:$0xff] %v1460_v1  ;;  %v559_v46 = vpack.c.bf16 %v1471_v18, %v1471_v18  ;;  %v560_v47 = vpack.c.bf16 %v1473_v19, %v1473_v19  ;;  %v506_v18 = vperm.slane %v1496_v8, 1 }
  0x7c   : > { %v601_v20 = vld.sshfl [vmem:[#allocation1] sm:$0xff pattern:$0x75316420]  ;;  %v602_v21 = vld.sshfl [vmem:[#allocation1 + $0x8] sm:$0xff pattern:$0x75316420] }
  0x7d   : > { %611 = vst [vmem:[#allocation1] ss:$2 sm:$0xff] %v1460_v1  ;;  %v1216_v22 = vpack.i.bf16 %v602_v21, %v601_v20  ;;  %v443_v20 = vunpack.c.l.bf16 %v439_v7 }
  0x7f   : > { %1217 = vrot.lane.b32.xlu2 %v1216_v22, %s1341_s13  ;;  %v337_v22 = vperm.slane %v1496_v8, 0 }
  0x84   : > { %v612_v23 = vld.sshfl [vmem:[#allocation1] sm:$0xff pattern:$0x75316420] }
  0x85   : > { %613 = vrot.lane.b32.xlu0 %v612_v23, %s1341_s13  ;;  %667 = vst [vmem:[#allocation1] ss:$2 sm:$0xff] %v1460_v1 }
  0x8c   : > { %v668_v24 = vld.sshfl [vmem:[#allocation1] sm:$0xff pattern:$0x75316420]  ;;  %v669_v25 = vld.sshfl [vmem:[#allocation1 + $0x8] sm:$0xff pattern:$0x75316420] }
  0x8d   : > { %v1221_v26 = vpack.i.bf16 %v669_v25, %v668_v24  ;;  %678 = vst [vmem:[#allocation1] ss:$2 sm:$0xff] %v1460_v1 }
  0x8f   : > { %1222 = vrot.lane.b32.xlu1 %v1221_v26, %s1342_s14 }
  0x94   : > { %v679_v27 = vld.sshfl [vmem:[#allocation1] sm:$0xff pattern:$0x75316420] }
  0x95   : > { %734 = vst [vmem:[#allocation1] ss:$2 sm:$0xff] %v1460_v1  ;;  %680 = vrot.lane.b32.xlu2 %v679_v27, %s1342_s14 }
  0x9c   : > { %v735_v28 = vld.sshfl [vmem:[#allocation1] sm:$0xff pattern:$0x75316420]  ;;  %v736_v29 = vld.sshfl [vmem:[#allocation1 + $0x8] sm:$0xff pattern:$0x75316420] }
  0x9d   : > { %v1226_v30 = vpack.i.bf16 %v736_v29, %v735_v28  ;;  %745 = vst [vmem:[#allocation1] ss:$2 sm:$0xff] %v1460_v1 }
  0x9f   : > { %1227 = vrot.lane.b32.xlu0 %v1226_v30, %s1343_s15  ;;  %v341_v30 = vunpack.c.l.bf16 %v337_v22 }
  0xa4   : > { %v746_v31 = vld.sshfl [vmem:[#allocation1] sm:$0xff pattern:$0x75316420] }
  0xa5   : > { %747 = vrot.lane.b32.xlu1 %v746_v31, %s1343_s15  ;;  %801 = vst [vmem:[#allocation1] ss:$2 sm:$0xff] %v1460_v1 }
  0xac   : > { %v802_v33 = vld.sshfl [vmem:[#allocation1] sm:$0xff pattern:$0x75316420]  ;;  %v803_v34 = vld.sshfl [vmem:[#allocation1 + $0x8] sm:$0xff pattern:$0x75316420] }
  0xad   : > { %812 = vst [vmem:[#allocation1] ss:$2 sm:$0xff] %v1460_v1  ;;  %v1231_v35 = vpack.i.bf16 %v803_v34, %v802_v33  ;;  %v1492_v1 = vpack.i.b16 %v330_v57, %v330_v57 }
  0xaf   : > { %1232 = vrot.lane.b32.xlu2 %v1231_v35, %s1344_s26  ;;  %v333_v21 = vperm.slane %v1492_v1, 0 }
  0xb1   : > { %v1203_v38 = vpop.permute.xlu1 %1202  ;;  %v340_v29 = vunpack.c.l.bf16 %v333_v21 }
  0xb2   : > { %v1205_v42 = vunpack.i.h.bf16 %v1203_v38  ;;  %v1204_v43 = vunpack.i.l.bf16 %v1203_v38 }
  0xb4   : > { %v813_v41 = vld.sshfl [vmem:[#allocation1] sm:$0xff pattern:$0x75316420]  ;;  %v288_v48 = vsel %vm284_vm1, %v1204_v43, %v1205_v42 }
  0xb5   : > { %814 = vrot.lane.b32.xlu0 %v813_v41, %s1344_s26  ;;  %v1070_v43 = vld [vmem:[%s1641_s1 + $0x4] sm:$0xf] }
  0xb9   : > { %v283_v49 = vpop.permute.xlu1 %282  ;;  %v1208_v50 = vpop.permute.xlu2 %1207 }
  0xba   : > { %v285_v51 = vsel %vm284_vm1, %v1205_v42, %v283_v49  ;;  %v1210_v55 = vunpack.i.h.bf16 %v1208_v50  ;;  %v1209_v56 = vunpack.i.l.bf16 %v1208_v50  ;;  %v570_v49 = vsel %vm352_vm3, %v560_v47, 0 }
  0xbb   : > { %v289_v52 = vpack.c.bf16 %v285_v51, %v288_v48  ;;  %v567_v48 = vsel %vm352_vm3, %v559_v46, 0 }
  0xbc   : > { %v436_v63 = vsel %vm432_vm2, %v1209_v56, %v1210_v55  ;;  %v1075_v56 = vld [vmem:[%s1641_s1 + $0x8] sm:$0xf] }
  0xbd   : > { %v303_v58 = vunpack.c.l.bf16 %v289_v52  ;;  %v304_v59 = vunpack.c.h.bf16 %v289_v52  ;;  %v505_v52 = vperm.slane %v1492_v1, 1 }
  0xbf   : > { %v307_v61 = vmul.f32 %v305_v53, %v303_v58  ;;  %v308_v62 = vmul.f32 %v306_v54, %v304_v59  ;;  %v509_v58 = vunpack.c.l.bf16 %v505_v52  ;;  %v510_v59 = vunpack.c.l.bf16 %v506_v18 }
  0xc0   : > { %v752_v18 = vperm.slane %v1492_v1, 3 }
  0xc1   : > { %v1198_v0 = vpop.permute.xlu0 %1197  ;;  %v309_v2 = vpack.c.bf16 %v307_v61, %v307_v61  ;;  %v310_v3 = vpack.c.bf16 %v308_v62, %v308_v62  ;;  %v431_v4 = vpop.permute.xlu2 %430 }
  0xc2   : > { %v433_v5 = vsel %vm432_vm2, %v1210_v55, %v431_v4  ;;  %v1200_v12 = vunpack.i.h.bf16 %v1198_v0  ;;  %v1199_v13 = vunpack.i.l.bf16 %v1198_v0 }
  0xc3   : > { %v389_v9 = vsel %vm352_vm3, %v309_v2, 0  ;;  %v392_v10 = vsel %vm352_vm3, %v310_v3, 0  ;;  %v437_v11 = vpack.c.bf16 %v433_v5, %v436_v63  ;;  %v1078_v5 = vld [vmem:[%s1641_s1 + $0xc] sm:$0xf] }
  0xc4   : > { %401 = vmatpush.bf16.msra.mxu2 %v389_v9  ;;  %414 = vmatpush.bf16.msra.mxu3 %v392_v10  ;;  %v328_v23 = vsel %vm324_vm4, %v1199_v13, %v1200_v12  ;;  %v1081_v10 = vld [vmem:[%s1641_s1 + $0x10] sm:$0xf] }
  0xc5   : > { %v440_v15 = vunpack.c.l.bf16 %v437_v11  ;;  %v441_v16 = vunpack.c.h.bf16 %v437_v11  ;;  %v618_v11 = vperm.slane %v1492_v1, 2 }
  0xc7   : > { %1073 = vmatmul.msk.bf16.vlgmr.msra.gmra.mxu2 %vm348_vm5, %v311_v14  ;;  %1074 = vmatmul.msk.bf16.vlgmr.msra.gmra.mxu3 %vm348_vm5, %v311_v14  ;;  %v444_v26 = vmul.f32 %v442_v17, %v440_v15  ;;  %v445_v27 = vmul.f32 %v443_v20, %v441_v16  ;;  %v622_v17 = vunpack.c.l.bf16 %v618_v11 }
  0xc9   : > { %v323_v24 = vpop.permute.xlu0 %322  ;;  %v446_v33 = vpack.c.bf16 %v444_v26, %v444_v26  ;;  %v447_v34 = vpack.c.bf16 %v445_v27, %v445_v27 }
  0xca   : > { %v325_v25 = vsel %vm324_vm4, %v1200_v12, %v323_v24  ;;  %v619_v12 = vperm.slane %v1496_v8, 2 }
  0xcb   : > { %v329_v28 = vpack.c.bf16 %v325_v25, %v328_v23  ;;  %v454_v39 = vsel %vm352_vm3, %v446_v33, 0  ;;  %v457_v40 = vsel %vm352_vm3, %v447_v34, 0 }
  0xcc   : > { %v623_v20 = vunpack.c.l.bf16 %v619_v12 }
  0xcd   : > { %v338_v31 = vunpack.c.l.bf16 %v329_v28  ;;  %v339_v32 = vunpack.c.h.bf16 %v329_v28 }
  0xcf   : > { %v342_v35 = vmul.f32 %v340_v29, %v338_v31  ;;  %v343_v36 = vmul.f32 %v341_v30, %v339_v32  ;;  %v685_v31 = vperm.slane %v1486_v44, 3  ;;  %v686_v32 = vperm.slane %v1488_v45, 3 }
  0xd1   : > { %v344_v37 = vpack.c.bf16 %v342_v35, %v342_v35  ;;  %v345_v38 = vpack.c.bf16 %v343_v36, %v343_v36  ;;  %v1084_v35 = vld [vmem:[%s1641_s1 + $0x14] sm:$0xf] }
  0xd3   : > { %v354_v41 = vsel %vm352_vm3, %v344_v37, 0  ;;  %v357_v42 = vsel %vm352_vm3, %v345_v38, 0 }
  0xd4   : > { %366 = vmatpush.bf16.msra.mxu0 %v354_v41  ;;  %379 = vmatpush.bf16.msra.mxu1 %v357_v42 }
  0xd7   : > { %1071 = vmatmul.msk.bf16.vlgmr.msra.gmra.mxu0 %vm348_vm5, %v1070_v43  ;;  %1072 = vmatmul.msk.bf16.vlgmr.msra.gmra.mxu1 %vm348_vm5, %v1070_v43 }
  0xd8   : > { %466 = vmatpush.bf16.msrb.mxu0 %v454_v39  ;;  %479 = vmatpush.bf16.msrb.mxu1 %v457_v40  ;;  %v689_v39 = vunpack.c.l.bf16 %v685_v31  ;;  %v690_v40 = vunpack.c.l.bf16 %v686_v32  ;;  %v1093_v32 = vld [vmem:[%s1641_s1 + $0x20] sm:$0xf] }
  0xd9   : > { %v1218_v6 = vpop.permute.xlu2 %1217 }
  0xda   : > { %v1220_v7 = vunpack.i.h.bf16 %v1218_v6  ;;  %v1219_v9 = vunpack.i.l.bf16 %v1218_v6 }
  0xdc   : > { %579 = vmatpush.bf16.msra.mxu0 %v567_v48  ;;  %592 = vmatpush.bf16.msra.mxu1 %v570_v49  ;;  %v608_v13 = vsel %vm607_vm7, %v1219_v9, %v1220_v7  ;;  %v1087_v49 = vld [vmem:[%s1641_s1 + $0x18] sm:$0xf] }
  0xdf   : > { %v498_v51 = vpop.permute.xlu1 %497 }
  0xe1   : > { %v1213_v50 = vpop.permute.xlu0 %1212 }
  0xe2   : > { %v1215_v53 = vunpack.i.h.bf16 %v1213_v50  ;;  %v1214_v54 = vunpack.i.l.bf16 %v1213_v50 }
  0xe4   : > { %v500_v19 = vsel %vm499_vm6, %v1215_v53, %v498_v51  ;;  %v503_v55 = vsel %vm499_vm6, %v1214_v54, %v1215_v53  ;;  %v753_v53 = vperm.slane %v1496_v8, 3 }
  0xe5   : > { %v504_v57 = vpack.c.bf16 %v500_v19, %v503_v55  ;;  %v269_v19 = vld [vmem:[%s1642_s2 + $0x8] sm:$0x11] }
  0xe7   : > { %v507_v60 = vunpack.c.l.bf16 %v504_v57  ;;  %v508_v61 = vunpack.c.h.bf16 %v504_v57  ;;  %1076 = vmatmul.msk.bf16.vlgmr.msrb.gmra.mxu0 %vm348_vm5, %v1075_v56  ;;  %1077 = vmatmul.msk.bf16.vlgmr.msrb.gmra.mxu1 %vm348_vm5, %v1075_v56  ;;  %v756_v57 = vunpack.c.l.bf16 %v752_v18 }
  0xe9   : > { %v511_v62 = vmul.f32 %v509_v58, %v507_v60  ;;  %v512_v63 = vmul.f32 %v510_v59, %v508_v61  ;;  %v757_v59 = vunpack.c.l.bf16 %v753_v53  ;;  %v820_v60 = vunpack.c.l.b16 %v269_v19 }
  0xea   : > { %v821_v61 = vunpack.c.h.b16 %v269_v19 }
  0xeb   : > { %v513_v0 = vpack.c.bf16 %v511_v62, %v511_v62  ;;  %v514_v2 = vpack.c.bf16 %v512_v63, %v512_v63 }
  0xec   : > { %v823_v1 = vpack.c.b16 %v821_v61, %v821_v61 }
  0xed   : > { %v521_v3 = vsel %vm352_vm3, %v513_v0, 0  ;;  %v524_v4 = vsel %vm352_vm3, %v514_v2, 0 }
  0xee   : > { %533 = vmatpush.bf16.msrb.mxu2 %v521_v3  ;;  %546 = vmatpush.bf16.msrb.mxu3 %v524_v4  ;;  %v822_v3 = vpack.c.b16 %v820_v60, %v820_v60 }
  0xef   : > { %v681_v30 = vpop.permute.xlu2 %680 }
  0xf0   : > { %v825_v9 = vpack.i.b16 %v822_v3, %v822_v3 }
  0xf1   : > { %1079 = vmatmul.msk.bf16.vlgmr.msrb.gmra.mxu2 %vm348_vm5, %v1078_v5  ;;  %1080 = vmatmul.msk.bf16.vlgmr.msrb.gmra.mxu3 %vm348_vm5, %v1078_v5 }
  0xf7   : > { %v614_v14 = vpop.permute.xlu0 %613  ;;  %1082 = vmatmul.msk.bf16.vlgmr.msra.gmra.mxu0 %vm348_vm5, %v1081_v10  ;;  %1083 = vmatmul.msk.bf16.vlgmr.msra.gmra.mxu1 %vm348_vm5, %v1081_v10  ;;  %v829_v10 = vpack.i.b16 %v823_v1, %v823_v1 }
  0xf8   : > { %v616_v15 = vsel %vm607_vm7, %v1220_v7, %v614_v14  ;;  %v827_v14 = vperm.slane %v825_v9, 0 }
  0xf9   : > { %v617_v16 = vpack.c.bf16 %v616_v15, %v608_v13  ;;  %v1090_v13 = vld [vmem:[%s1641_s1 + $0x1c] sm:$0xf]  ;;  %v831_v15 = vperm.slane %v829_v10, 0 }
  0xfb   : > { %v620_v21 = vunpack.c.l.bf16 %v617_v16  ;;  %v621_v22 = vunpack.c.h.bf16 %v617_v16 }
  0xfd   : > { %v624_v23 = vmul.f32 %v622_v17, %v620_v21  ;;  %v625_v24 = vmul.f32 %v623_v20, %v621_v22  ;;  %v834_v22 = vunpack.c.l.bf16 %v827_v14 }
  0xff   : > { %v626_v25 = vpack.c.bf16 %v624_v23, %v624_v23  ;;  %v627_v26 = vpack.c.bf16 %v625_v24, %v625_v24  ;;  %v835_v23 = vunpack.c.l.bf16 %v831_v15 }
 0x101   : > { %v1223_v27 = vpop.permute.xlu1 %1222  ;;  %v634_v28 = vsel %vm352_vm3, %v626_v25, 0  ;;  %v637_v29 = vsel %vm352_vm3, %v627_v26, 0 }
 0x102   : > { %v1225_v33 = vunpack.i.h.bf16 %v1223_v27  ;;  %v1224_v34 = vunpack.i.l.bf16 %v1223_v27  ;;  %646 = vmatpush.bf16.msra.mxu2 %v634_v28  ;;  %659 = vmatpush.bf16.msra.mxu3 %v637_v29 }
 0x104   : > { %v675_v36 = vsel %vm674_vm8, %v1224_v34, %v1225_v33  ;;  %v683_v37 = vsel %vm674_vm8, %v1225_v33, %v681_v30 }
 0x105   : > { %v684_v38 = vpack.c.bf16 %v683_v37, %v675_v36  ;;  %1085 = vmatmul.msk.bf16.vlgmr.msra.gmra.mxu2 %vm348_vm5, %v1084_v35  ;;  %1086 = vmatmul.msk.bf16.vlgmr.msra.gmra.mxu3 %vm348_vm5, %v1084_v35 }
 0x107   : > { %v687_v44 = vunpack.c.l.bf16 %v684_v38  ;;  %v688_v41 = vunpack.c.h.bf16 %v684_v38 }
 0x109   : > { %v691_v45 = vmul.f32 %v689_v39, %v687_v44  ;;  %v692_v42 = vmul.f32 %v690_v40, %v688_v41  ;;  %v1233_v5 = vpop.permute.xlu2 %1232 }
 0x10a   : > { %v1235_v11 = vunpack.i.h.bf16 %v1233_v5  ;;  %v1234_v12 = vunpack.i.l.bf16 %v1233_v5 }
 0x10b   : > { %v693_v43 = vpack.c.bf16 %v691_v45, %v691_v45  ;;  %v694_v46 = vpack.c.bf16 %v692_v42, %v692_v42 }
 0x10c   : > { %v809_v16 = vsel %vm808_vm10, %v1234_v12, %v1235_v11 }
 0x10d   : > { %v701_v47 = vsel %vm352_vm3, %v693_v43, 0  ;;  %v704_v48 = vsel %vm352_vm3, %v694_v46, 0 }
 0x10e   : > { %713 = vmatpush.bf16.msrb.mxu0 %v701_v47  ;;  %726 = vmatpush.bf16.msrb.mxu1 %v704_v48 }
 0x111   : > { %1088 = vmatmul.msk.bf16.vlgmr.msrb.gmra.mxu0 %vm348_vm5, %v1087_v49  ;;  %1089 = vmatmul.msk.bf16.vlgmr.msrb.gmra.mxu1 %vm348_vm5, %v1087_v49  ;;  %v1228_v50 = vpop.permute.xlu0 %1227 }
 0x112   : > { %v1230_v51 = vunpack.i.h.bf16 %v1228_v50  ;;  %v1229_v52 = vunpack.i.l.bf16 %v1228_v50 }
 0x114   : > { %v742_v54 = vsel %vm741_vm9, %v1229_v52, %v1230_v51 }
 0x117   : > { %v748_v55 = vpop.permute.xlu1 %747 }
 0x118   : > { %v750_v56 = vsel %vm741_vm9, %v1230_v51, %v748_v55 }
 0x119   : > { %v751_v58 = vpack.c.bf16 %v750_v56, %v742_v54 }
 0x11b   : > { %v754_v62 = vunpack.c.l.bf16 %v751_v58  ;;  %v755_v63 = vunpack.c.h.bf16 %v751_v58 }
 0x11d   : > { %v758_v0 = vmul.f32 %v756_v57, %v754_v62  ;;  %v759_v2 = vmul.f32 %v757_v59, %v755_v63 }
 0x11f   : > { %v760_v4 = vpack.c.bf16 %v758_v0, %v758_v0  ;;  %v761_v8 = vpack.c.bf16 %v759_v2, %v759_v2 }
 0x121   : > { %v768_v6 = vsel %vm352_vm3, %v760_v4, 0  ;;  %v771_v7 = vsel %vm352_vm3, %v761_v8, 0 }
 0x122   : > { %780 = vmatpush.bf16.msrb.mxu2 %v768_v6  ;;  %793 = vmatpush.bf16.msrb.mxu3 %v771_v7 }
 0x125   : > { %1091 = vmatmul.msk.bf16.vlgmr.msrb.gmra.mxu2 %vm348_vm5, %v1090_v13  ;;  %1092 = vmatmul.msk.bf16.vlgmr.msrb.gmra.mxu3 %vm348_vm5, %v1090_v13 }
 0x127   : > { %v815_v17 = vpop.permute.xlu0 %814 }
 0x128   : > { %v817_v20 = vsel %vm808_vm10, %v1235_v11, %v815_v17 }
 0x129   : > { %v818_v21 = vpack.c.bf16 %v817_v20, %v809_v16 }
 0x12b   : > { %v832_v24 = vunpack.c.l.bf16 %v818_v21  ;;  %v833_v25 = vunpack.c.h.bf16 %v818_v21 }
 0x12d   : > { %v836_v26 = vmul.f32 %v834_v22, %v832_v24  ;;  %v837_v27 = vmul.f32 %v835_v23, %v833_v25  ;;  %v884_v23 = vld [vmem:[#allocation3] sm:$0xff] }
 0x12f   : > { %v838_v28 = vpack.c.bf16 %v836_v26, %v836_v26  ;;  %v839_v29 = vpack.c.bf16 %v837_v27, %v837_v27 }
 0x131   : > { %v846_v30 = vsel %vm352_vm3, %v838_v28, 0  ;;  %v849_v31 = vsel %vm352_vm3, %v839_v29, 0 }
 0x132   : > { %858 = vmatpush.bf16.msra.mxu0 %v846_v30  ;;  %871 = vmatpush.bf16.msra.mxu1 %v849_v31 }
 0x135   : > { %1094 = vmatmul.msk.bf16.vlgmr.msra.gmra.mxu0 %vm348_vm5, %v1093_v32  ;;  %1095 = vmatmul.msk.bf16.vlgmr.msra.gmra.mxu1 %vm348_vm5, %v1093_v32 }
 0x14a   : > { %v403_v33 = vpop.f32.mrf.mxu2  ;;  %v416_v34 = vpop.f32.mrf.mxu3 }
 0x152   : > { %v405_v35 = vpop.f32.mrf.mxu2  ;;  %v418_v36 = vpop.f32.mrf.mxu3 }
 0x154   : > { %v368_v37 = vpop.f32.mrf.mxu0  ;;  %v381_v38 = vpop.f32.mrf.mxu1 }
 0x155   : > { %v404_v39 = vadd.f32 %v403_v33, %v368_v37  ;;  %v417_v40 = vadd.f32 %v416_v34, %v381_v38 }
 0x15c   : > { %v370_v44 = vpop.f32.mrf.mxu0  ;;  %v383_v41 = vpop.f32.mrf.mxu1 }
 0x164   : > { %v468_v45 = vpop.f32.mrf.mxu0  ;;  %v481_v42 = vpop.f32.mrf.mxu1 }
 0x165   : > { %v485_v43 = vadd.f32 %v468_v45, %v404_v39  ;;  %v486_v46 = vadd.f32 %v481_v42, %v417_v40 }
 0x16c   : > { %v470_v47 = vpop.f32.mrf.mxu0  ;;  %v483_v48 = vpop.f32.mrf.mxu1 }
 0x174   : > { %v535_v49 = vpop.f32.mrf.mxu2  ;;  %v548_v50 = vpop.f32.mrf.mxu3 }
 0x175   : > { %v581_v51 = vpop.f32.mrf.mxu0  ;;  %v594_v52 = vpop.f32.mrf.mxu1  ;;  %v552_v63 = vadd.f32 %v535_v49, %v485_v43  ;;  %v553_v0 = vadd.f32 %v548_v50, %v486_v46 }
 0x177   : > { %v598_v1 = vadd.f32 %v581_v51, %v552_v63  ;;  %v599_v4 = vadd.f32 %v594_v52, %v553_v0 }
 0x17c   : > { %v537_v18 = vpop.f32.mrf.mxu2  ;;  %v550_v53 = vpop.f32.mrf.mxu3 }
 0x17d   : > { %v583_v54 = vpop.f32.mrf.mxu0  ;;  %v596_v19 = vpop.f32.mrf.mxu1 }
 0x188   : > { %v648_v55 = vpop.f32.mrf.mxu2  ;;  %v661_v56 = vpop.f32.mrf.mxu3 }
 0x189   : > { %v665_v8 = vadd.f32 %v648_v55, %v598_v1  ;;  %v666_v5 = vadd.f32 %v661_v56, %v599_v4 }
 0x18e   : > { %v715_v57 = vpop.f32.mrf.mxu0  ;;  %v728_v58 = vpop.f32.mrf.mxu1 }
 0x18f   : > { %v732_v6 = vadd.f32 %v715_v57, %v665_v8  ;;  %v733_v7 = vadd.f32 %v728_v58, %v666_v5 }
 0x190   : > { %v650_v59 = vpop.f32.mrf.mxu2  ;;  %v663_v60 = vpop.f32.mrf.mxu3 }
 0x196   : > { %v717_v61 = vpop.f32.mrf.mxu0  ;;  %v730_v62 = vpop.f32.mrf.mxu1 }
 0x1a8   : > { %v782_v2 = vpop.f32.mrf.mxu2  ;;  %v795_v3 = vpop.f32.mrf.mxu3 }
 0x1a9   : > { %v799_v11 = vadd.f32 %v782_v2, %v732_v6  ;;  %v800_v12 = vadd.f32 %v795_v3, %v733_v7 }
 0x1b0   : > { %v784_v9 = vpop.f32.mrf.mxu2  ;;  %v797_v10 = vpop.f32.mrf.mxu3 }
 0x1b2   : > { %v860_v13 = vpop.f32.mrf.mxu0  ;;  %v873_v14 = vpop.f32.mrf.mxu1 }
 0x1b3   : > { %v877_v15 = vadd.f32 %v860_v13, %v799_v11  ;;  %v878_v16 = vadd.f32 %v873_v14, %v800_v12 }
 0x1b5   : > { %v879_v17 = vpack.c.bf16 %v878_v16, %v877_v15  ;;  %v885_v20 = vadd.f32 %v878_v16, %v877_v15 }
 0x1b7   : > { %883 = vst [vmem:[%s882_s8] sm:$0xff] %v879_v17  ;;  %886 = vadd.xlane.f32.xlu1 %v885_v20 }
 0x1ba   : > { %v862_v21 = vpop.f32.mrf.mxu0  ;;  %v875_v22 = vpop.f32.mrf.mxu1 }
 0x22a   : > { %v887_v24 = vpop.xlane.xlu1 %886 }
 0x22b   : > { %v888_v25 = vadd.f32 %v887_v24, %v884_v23 }
 0x22d   : > { %889 = vst.msk [vmem:[#allocation3] sm:$0xff] %vm499_vm6, %v888_v25 }
 0x22e PF: > { %p1098_p5 = scmp.ne.s32.totalorder %s1322_s22, 1 }
 0x22f   : > { %s1111_s9 = sshll.u32 (!%p1098_p5), %s1318_s21, 3 }
 0x230   : > { %893 = sbr.rel (%p1098_p5) target bundleno = 808 (0x328), region = 52  ;;  %s898_s10 = scalar_lea.vmem (!%p1098_p5), [#allocation2], %s1111_s9 }
 0x235   : > { %v894_v26 = vld [vmem:[#allocation3] sm:$0xff]  ;;  %v1345_v27 = vmov 0   ;;  %v899_v29 = vld [vmem:[%s898_s10] sm:$0xff]  ;;  %vm916_vm11 = vcmask 7168  }
 0x236   : > { %1236 = vset.pattern.permute.xlu0 %v1345_v27  ;;  %v895_v28 = vmul.f32 0.001953125, %v894_v26  ;;  %v900_v30 = vunpack.c.l.bf16 %v899_v29  ;;  %v901_v31 = vunpack.c.h.bf16 %v899_v29  ;;  %v909_v38 = vld [vmem:[#allocation4] sm:$0xff] }
 0x238   : > { %904 = vperm.xlu0 %1236, %v895_v28  }
 0x2aa   : > { %v905_v32 = vpop.permute.xlu0 %904 }
 0x2ab   : > { %v907_v33 = vsub.f32 %v900_v30, %v905_v32  ;;  %v908_v34 = vsub.f32 %v901_v31, %v905_v32 }
 0x2ad   : > { %v910_v35 = vmul.f32 %v907_v33, %v907_v33  ;;  %v911_v36 = vmul.f32 %v908_v34, %v908_v34 }
 0x2af   : > { %v912_v37 = vadd.f32 %v911_v36, %v910_v35 }
 0x2b1   : > { %913 = vadd.xlane.f32.xlu0 %v912_v37 }
 0x324   : > { %v914_v39 = vpop.xlane.xlu0 %913 }
 0x325   : > { %v915_v40 = vadd.f32 %v914_v39, %v909_v38 }
 0x327   : > { %917 = vst.msk [vmem:[#allocation4] sm:$0xff] %vm916_vm11, %v915_v40 }
 0x328 PF: > { %p1101_p6 = scmp.ne.s32.totalorder %s1322_s22, 2 }
 0x329   : > { %s1112_s17 = sshll.u32 (!%p1101_p6), %s1318_s21, 3 }
 0x32a   : > { %921 = sbr.rel (%p1101_p6) target bundleno = 969 (0x3c9), region = 56  ;;  %s944_s26 = scalar_lea.vmem (!%p1101_p6), [#allocation2], %s1112_s17 }
 0x32f   : > { %v924_v44 = vld [vmem:[#allocation4] sm:$0xff]  ;;  %v1346_v41 = vmov 0   ;;  %v922_v50 = vld [vmem:[#allocation3] sm:$0xff] }
 0x330   : > { %1237 = vset.pattern.permute.xlu0 %v1346_v41  ;;  %v925_v45 = vmul.f32 0.001953125, %v924_v44  ;;  %v926_v51 = vld [vmem:[%s1643_s3] sm:$0xff]  ;;  %v923_v18 = vmul.f32 0.001953125, %v922_v50 }
 0x331   : > { %v939_v55 = vld [vmem:[%s1644_s4] sm:$0xff] }
 0x332   : > { %v927_v42 = vadd.f32 0.001, %v925_v45  ;;  %v945_v57 = vld [vmem:[%s944_s26] sm:$0xff] }
 0x333   : > { %v946_v59 = vunpack.c.l.bf16 %v945_v57  ;;  %v947_v60 = vunpack.c.h.bf16 %v945_v57 }
 0x334   : > { %1238 = vrsqrt.f32 %v927_v42  ;;  %vm934_vm12 = vweird.f32 %v927_v42 }
 0x33a   : > { %v1239_v43 = vpop.eup %1238 }
 0x33b   : > { %v929_v46 = vmul.f32 %v1239_v43, %v927_v42  ;;  %vm935_vm13 = vweird.f32 %v1239_v43 }
 0x33c   : > { %vm936_vm14 = vmor %vm934_vm12, %vm935_vm13 }
 0x33d   : > { %v930_v47 = vmul.f32 %v1239_v43, %v929_v46 }
 0x33f   : > { %v931_v48 = vmul.f32 0.5, %v930_v47 }
 0x341   : > { %v932_v49 = vsub.f32 1.5, %v931_v48 }
 0x343   : > { %v933_v52 = vmul.f32 %v1239_v43, %v932_v49 }
 0x345   : > { %v937_v53 = vsel %vm936_vm14, %v1239_v43, %v933_v52 }
 0x346   : > { %v938_v54 = vmul.f32 %v937_v53, %v926_v51 }
 0x348   : > { %950 = vperm.xlu0 %1237, %v938_v54   ;;  %v940_v19 = vmul.f32 %v938_v54, %v923_v18 }
 0x34a   : > { %v941_v56 = vsub.f32 %v939_v55, %v940_v19 }
 0x350   : > { %957 = vperm.xlu0 %1237, %v941_v56  }
 0x3ba   : > { %v951_v58 = vpop.permute.xlu0 %950 }
 0x3bb   : > { %v953_v61 = vmul.f32 %v951_v58, %v946_v59  ;;  %v954_v62 = vmul.f32 %v951_v58, %v947_v60 }
 0x3c2   : > { %v958_v63 = vpop.permute.xlu0 %957 }
 0x3c3   : > { %v960_v0 = vadd.f32 %v958_v63, %v953_v61  ;;  %v961_v2 = vadd.f32 %v958_v63, %v954_v62 }
 0x3c5   : > { %v962_v3 = vmax.f32 %v960_v0, 0.0  ;;  %v963_v1 = vmax.f32 %v961_v2, 0.0 }
 0x3c7   : > { %964 = vst [vmem:[%s1457_s29] sm:$0xff] %v962_v3 }
 0x3c8   : > { %965 = vst [vmem:[%s1457_s29 + $0x8] sm:$0xff] %v963_v1 }
 0x3c9 PF: > { %p974_p9 = scmp.eq.s32.totalorder %s1322_s22, 2  ;;  %s982_s30 = sshll.u32 %s1457_s29, 4  ;;  %s983_s30 = int_to_ptr.vmem [resolvable:$true] %s982_s30 }
 0x3ca   : > { %s967_s15 = scalar_lea.sflag [#allocation6], %s241_s12 }
 0x3cb   : > { %s1666_s21 = smov (!%p974_p9, %s1318_s21), 0 }
 0x3cc   : > { %s1113_s8 = sshll.u32 %s1666_s21, 4  ;;  %s1260_s21 = scalar_lea.hbm %s1645_s5, 32 }
 0x3cd   : > { %s980_s13 = scalar_lea.hbm %s1645_s5, %s1113_s8 }
 0x3ce   : > { %s984_s14 = sshll.u32 %s980_s13, 4  ;;  %s985_s14 = int_to_ptr.hbm [resolvable:$true] %s984_s14 }
 0x3cf   : > { %s1254_s16 = sshra.s32 %s985_s14, 4  ;;  %s1255_s16 = int_to_ptr.hbm [resolvable:$true] %s1254_s16 }
 0x3d0   : > { %s1256_s17 = scalar_lea.hbm %s1255_s16, 16  ;;  %p1261_p13 = scmp.lt.s32.totalorder %s1255_s16, %s1645_s5 }
 0x3d1   : > { %p1257_p10 = scmp.ne.s32.totalorder %s1255_s16, %s1256_s17  ;;  %p1262_p0 = scmp.lt.s32.totalorder %s1260_s21, %s1256_s17 }
 0x3d3   : > { %p1258_p11 = pnand %p1257_p10, %p1432_p7  ;;  %p1263_p1 = por %p1262_p0, %p1261_p13 }
 0x3d5   : > { %p1259_p12 = pneg %p1258_p11 }
 0x3d7   : > { %p1264_p2 = pnand %p1263_p1, %p1259_p12 }
 0x3d9   : > { %1267 = shalt.err (!%p1264_p2)
}
 0x3da   : > { %1114 = dma.vmem_to_hbm [thread:$0]  (%p1432_p7), %s983_s30, 256, %s985_s14, %s967_s15  }
 0x3db PF: > { %p1120_p3 = scmp.ge.s32.totalorder %s1334_s25, 2  ;;  %s996_s12 = sand.u32 1, %s1306_s18  }
 0x3dc   : > { %s997_s8 = scalar_lea.sflag [#allocation6], %s996_s12 }
 0x3dd   : > { %p1117_p4 = pnand %p1120_p3, %p1436_p8 }
 0x3df   : > { %p1118_p5 = pneg %p1117_p4 }
 0x3e1   : > { %1301 = dma.done.wait (%p1118_p5), %s997_s8, 256  }
 0x3e2   : > { %1303 = vsyncadd (%p1118_p5), %s997_s8, 4294967040  ;;  %s18_s25 = sadd.s32 1, %s1334_s25   ;;  %s1650_s18 = smov %s1310_s19 }
 0x3e3   : > { %p15_p6 = scmp.ge.s32.totalorder %s18_s25, 8   ;;  %s1651_s19 = smov %s1314_s20 }
 0x3e4   : > { %s1652_s20 = smov %s1446_s11  ;;  %s1653_s21 = smov %s1326_s23 }
 0x3e5   : > { %s1654_s22 = smov %s1330_s24  ;;  %s1655_s23 = smov %s1658_s27 }
 0x3e6   : > { %s1656_s24 = smov %s1662_s28  ;;  %17 = sbr.rel (!%p15_p6) target bundleno = 7 (0x7), region = 102 }
 0x3eb   :  { %1003 = vsyncpa [#allocation6], 1 }
 0x3ec   :  { %1005 = vsyncpa [#allocation6 + $0x1], 1 }

</bundles_post_ra>
